<compile_context>
chip_gen: v6e
topology: v6e:2x2x1
jax: 0.10.0
libtpu: 0.0.40
codegen_flags: <defaults>
</compile_context>

<pallas_src>
import functools

import jax
import jax.numpy as jnp
from jax.experimental import pallas as pl
from jax.experimental.pallas import tpu as pltpu


def _round_up(x: int, m: int) -> int:
    return ((x + m - 1) // m) * m


def _linear_relu_kernel(x_ref, w_ref, b_ref, o_ref):
    # x_ref : (tile, K_big)   VMEM, f32  (packed rows, lane-dense)
    # w_ref : (K_big, N_big)  VMEM, bf16 (block-diagonal weight, resident)
    # b_ref : (1, N_big)      VMEM, f32  (tiled bias)
    # o_ref : (tile, N_big)   VMEM, bf16 (lane-dense output)
    x = x_ref[...].astype(w_ref.dtype)                     # in-kernel cast (VPU, hidden under DMA)
    y = jnp.dot(x, w_ref[...], preferred_element_type=jnp.float32)
    y = y + b_ref[...]                                     # f32 bias broadcast
    o_ref[...] = jnp.maximum(y, 0.0).astype(o_ref.dtype)   # ReLU, store bf16


def prepare_atom_encoder_params(weight, bias, *, compute_dtype=jnp.bfloat16, max_pack=8):
    """One-time packing of PyTorch-layout Linear params for the Pallas kernel.

    weight: [output_dim, input_dim]  (PyTorch nn.Linear layout)
    bias:   [output_dim]

    Returns (w_big, b_big, pack):
      w_big: [pack*k_pad, pack*out_pad]  block-diagonal (or lane-padded), compute_dtype
      b_big: [1, pack*out_pad]           f32
      pack:  number of logical rows folded into one physical (lane-dense) row
    """
    output_dim, input_dim = weight.shape

    pack = None
    for p in range(1, max_pack + 1):
        if (p * input_dim) % 128 == 0 and (p * output_dim) % 128 == 0:
            pack = p
            break

    if pack is not None:
        # Lane-dense packing: kron(I_pack, W.T) block-diagonal weight, tiled bias.
        wt = weight.T.astype(compute_dtype)                          # [in, out]
        w_big = jnp.kron(jnp.eye(pack, dtype=compute_dtype), wt)     # [pack*in, pack*out]
        b_big = jnp.tile(bias.astype(jnp.float32), pack).reshape(1, pack * output_dim)
    else:
        # Fallback for awkward dims: zero-pad K/N up to 128-lane multiples, pack=1.
        # Same lane density, tiny weight footprint (no pack^2 blow-up).
        pack = 1
        k_pad = _round_up(input_dim, 128)
        out_pad = _round_up(output_dim, 128)
        w_big = jnp.zeros((k_pad, out_pad), compute_dtype)
        w_big = w_big.at[:input_dim, :output_dim].set(weight.T.astype(compute_dtype))
        b_big = jnp.zeros((1, out_pad), jnp.float32)
        b_big = b_big.at[0, :output_dim].set(bias.astype(jnp.float32))

    return w_big, b_big, pack


@functools.partial(
    jax.jit, static_argnames=("pack", "output_dim", "tile_rows", "trim_output")
)
def atom_encoder(x, w_big, b_big, *, pack, output_dim, tile_rows=2048, trim_output=True):
    """relu(x @ W.T + b) with pre-packed params (see prepare_atom_encoder_params).

    x: [N, input_dim] float32 -> returns [N, output_dim] bfloat16.
    tile_rows: packed rows per grid step (multiple of 16).  2048 keeps the
      double-buffered footprint ~4-5 MiB (safe under v5e's 16 MiB scoped VMEM)
      while giving >1 MiB DMA per step to amortize the ~0.35us step overhead
      on v6e/v7x.  Raise to 4096 on v7x if batches are large.
    trim_output: keep True for module semantics; callers that consume the
      padded/packed output directly can pass False to skip the slice pass.
    """
    N, input_dim = x.shape
    k_big, out_big = w_big.shape
    k_pad = k_big // pack            # features per logical row expected by the kernel
    out_per_row = out_big // pack    # outputs per logical row produced by the kernel

    # ---- feature-dim zero-pad (only in the pack=1 fallback path) ------------
    if k_pad != input_dim:
        x = jnp.pad(x, ((0, 0), (0, k_pad - input_dim)))

    # ---- lane-dense row packing (pad rows only to a pack*16 multiple) -------
    n_phys = pl.cdiv(N, pack)
    n_phys_pad = _round_up(n_phys, 16)          # sublane/bf16 tiling alignment
    n_pad = n_phys_pad * pack
    if n_pad != N:
        x = jnp.pad(x, ((0, n_pad - N), (0, 0)))
    x_packed = x.reshape(n_phys_pad, k_big)     # contiguous -> free reshape

    tile = min(_round_up(tile_rows, 16), n_phys_pad)
    grid = (pl.cdiv(n_phys_pad, tile),)         # partial last block masked by Pallas

    # Advisory cost: actual MXU flops of the block-diagonal matmul + real bytes.
    flops = 2 * n_phys_pad * k_big * out_big
    bytes_accessed = (
        x_packed.size * x_packed.dtype.itemsize
        + w_big.size * w_big.dtype.itemsize
        + b_big.size * b_big.dtype.itemsize
        + n_phys_pad * out_big * 2              # bf16 output
    )

    out = pl.pallas_call(
        _linear_relu_kernel,
        out_shape=jax.ShapeDtypeStruct((n_phys_pad, out_big), jnp.bfloat16),
        grid=grid,
        in_specs=[
            pl.BlockSpec((tile, k_big), lambda i: (i, 0)),
            pl.BlockSpec((k_big, out_big), lambda i: (0, 0)),   # grid-invariant, stays resident
            pl.BlockSpec((1, out_big), lambda i: (0, 0)),
        ],
        out_specs=pl.BlockSpec((tile, out_big), lambda i: (i, 0)),
        compiler_params=pltpu.CompilerParams(
            dimension_semantics=("parallel",),
        ),
        cost_estimate=pl.CostEstimate(
            flops=flops, transcendentals=0, bytes_accessed=bytes_accessed
        ),
    )(x_packed, w_big, b_big)

    if not trim_output:
        return out  # (n_phys_pad, out_big) packed; padded rows hold relu(bias).

    out = out.reshape(n_pad, out_per_row)       # free contiguous reshape
    if out_per_row != output_dim:
        return out[:N, :output_dim]
    return out[:N]


if __name__ == "__main__":
    # AtomEncoder(output_dim, input_dim=(input_dim0, ...)) at small shapes.
    input_dim0 = 32
    output_dim = 64
    batch = 37  # deliberately not a multiple of the packing factor

    key = jax.random.PRNGKey(0)
    kx, kw, kb = jax.random.split(key, 3)

    # nn.Linear default init: U(-1/sqrt(in), 1/sqrt(in))
    bound = 1.0 / (input_dim0 ** 0.5)
    weight = jax.random.uniform(kw, (output_dim, input_dim0),
                                minval=-bound, maxval=bound, dtype=jnp.float32)
    bias = jax.random.uniform(kb, (output_dim,),
                              minval=-bound, maxval=bound, dtype=jnp.float32)
    x = jax.random.normal(kx, (batch, input_dim0), dtype=jnp.float32)

    # One-time param packing (hoisted out of the per-call path).
    w_big, b_big, pack = prepare_atom_encoder_params(weight, bias)

    out = atom_encoder(x, w_big, b_big, pack=pack, output_dim=output_dim)
    out = jax.block_until_ready(out)
    assert out.shape == (batch, output_dim)
    assert out.dtype == jnp.bfloat16

    out_f32 = out.astype(jnp.float32)

    # Reference with matched numerics (bf16-rounded x/weight, f32 accumulation,
    # bf16 output rounding accounted for by the tolerance).
    x_b = x.astype(jnp.bfloat16).astype(jnp.float32)
    w_b = weight.astype(jnp.bfloat16).astype(jnp.float32)
    ref_bf16 = jnp.maximum(x_b @ w_b.T + bias, 0.0)
    assert jnp.allclose(out_f32, ref_bf16, atol=2e-2, rtol=2e-2)

    # Full-precision PyTorch-equivalent reference (loose tolerance: bf16 I/O).
    ref_f32 = jnp.maximum(x @ weight.T + bias, 0.0)
    assert jnp.allclose(out_f32, ref_f32, atol=5e-2, rtol=5e-2)

    print("KERNEL_OK")
</pallas_src>

<mosaic_0001>
module attributes {stable_mosaic.version = 11 : i64} {
  func.func @_linear_relu_kernel(%arg0: i32, %arg1: memref<16x128xf32, #tpu.memory_space<vmem>>, %arg2: memref<128x256xbf16, #tpu.memory_space<vmem>>, %arg3: memref<1x256xf32, #tpu.memory_space<vmem>>, %arg4: memref<16x256xbf16, #tpu.memory_space<vmem>>) attributes {dimension_semantics = [#tpu.dimension_semantics<parallel>], iteration_bounds = array<i64: 1>, scalar_prefetch = 0 : i64, scratch_operands = 0 : i64, tpu.core_type = #tpu.core_type<tc>, window_params = [{transform_indices = @transform_0, window_bounds = array<i64: 16, 128>}, {pipeline_mode = #tpu.pipeline_mode<synchronous>, transform_indices = @transform_1, window_bounds = array<i64: 128, 256>}, {pipeline_mode = #tpu.pipeline_mode<synchronous>, transform_indices = @transform_2, window_bounds = array<i64: 1, 256>}, {transform_indices = @transform_3, window_bounds = array<i64: 16, 256>}]} {
    %c0 = arith.constant 0 : index
    %c0_0 = arith.constant 0 : index
    %0 = vector.load %arg1[%c0, %c0_0] : memref<16x128xf32, #tpu.memory_space<vmem>>, vector<16x128xf32>
    %1 = arith.truncf %0 : vector<16x128xf32> to vector<16x128xbf16>
    %c0_1 = arith.constant 0 : index
    %c0_2 = arith.constant 0 : index
    %2 = vector.load %arg2[%c0_1, %c0_2] : memref<128x256xbf16, #tpu.memory_space<vmem>>, vector<128x256xbf16>
    %cst = arith.constant dense<0.000000e+00> : vector<16x256xf32>
    %3 = tpu.matmul %1, %2, %cst {dimension_numbers = #tpu.dot_dimension_numbers<[1], [0], [0], [1], [0, 0, 1, 1], [], []>} : vector<16x128xbf16>, vector<128x256xbf16>, vector<16x256xf32> -> vector<16x256xf32>
    %c0_3 = arith.constant 0 : index
    %c0_4 = arith.constant 0 : index
    %4 = vector.load %arg3[%c0_3, %c0_4] : memref<1x256xf32, #tpu.memory_space<vmem>>, vector<1x256xf32>
    %5 = vector.broadcast %4 : vector<1x256xf32> to vector<16x256xf32>
    %6 = arith.addf %3, %5 : vector<16x256xf32>
    %cst_5 = arith.constant 0.000000e+00 : f32
    %7 = vector.broadcast %cst_5 : f32 to vector<16x256xf32>
    %8 = arith.maximumf %6, %7 : vector<16x256xf32>
    %9 = arith.truncf %8 : vector<16x256xf32> to vector<16x256xbf16>
    %c0_6 = arith.constant 0 : index
    %c0_7 = arith.constant 0 : index
    %10 = vector.load %arg4[%c0_6, %c0_7] : memref<16x256xbf16, #tpu.memory_space<vmem>>, vector<16x256xbf16>
    tpu.vector_store %arg4[%c0_6, %c0_7], %9 {strides = array<i32>} : memref<16x256xbf16, #tpu.memory_space<vmem>>, vector<16x256xbf16>,
    return
  }
  func.func @transform_0(%arg0: i32) -> (i32, i32) {
    %c0_i32 = arith.constant 0 : i32
    %c0_i32_0 = arith.constant 0 : i32
    return %arg0, %c0_i32 : i32, i32
  }
  func.func @transform_1(%arg0: i32) -> (i32, i32) {
    %c0_i32 = arith.constant 0 : i32
    %c0_i32_0 = arith.constant 0 : i32
    %c0_i32_1 = arith.constant 0 : i32
    return %c0_i32, %c0_i32_0 : i32, i32
  }
  func.func @transform_2(%arg0: i32) -> (i32, i32) {
    %c0_i32 = arith.constant 0 : i32
    %c0_i32_0 = arith.constant 0 : i32
    %c0_i32_1 = arith.constant 0 : i32
    return %c0_i32, %c0_i32_0 : i32, i32
  }
  func.func @transform_3(%arg0: i32) -> (i32, i32) {
    %c0_i32 = arith.constant 0 : i32
    %c0_i32_0 = arith.constant 0 : i32
    return %arg0, %c0_i32 : i32, i32
  }
}

</mosaic_0001>

<bundles_post_ra>
// kernel: atom_encoder.1
= control target key start
LH: loop header
LB: loop body
LE: loop exit
PB: predicated region body
PF: predicated region fallthrough
CT: control target
= control target key end

     0   :  { %v236_v1 = vmov 0   ;;  %v36_v20 = vlaneseq  ;;  %s320_s1 = inlined_call_operand.vmem [shape: bf16[128,256], index: 1, kind: input, shape index: {}]   ;;  %s321_s0 = inlined_call_operand.vmem [shape: f32[16,128], index: 0, kind: input, shape index: {}]   ;;  %s322_s2 = inlined_call_operand.vmem [shape: f32[1,256], index: 2, kind: input, shape index: {}]   ;;  %s323_s3 = inlined_call_operand.vmem [shape: bf16[16,256], index: 3, kind: output, shape index: {}]  }
   0x1   :  { %v212_v0 = vld [vmem:[%s320_s1 + $0x74] ss:$8 sps:$4 sm:$0xff]   ;;  %158 = vmatprep.mubr.bf16.mxu0 %v236_v1  ;;  %v214_v2 = vld [vmem:[%s320_s1 + $0x70] ss:$8 sps:$4 sm:$0xff]   ;;  %v215_v3 = vld [vmem:[%s320_s1 + $0x64] ss:$8 sps:$4 sm:$0xff]  }
   0x2   :  { %126 = vmatprep.subr.bf16.mxu0 %v212_v0  ;;  %v217_v4 = vld [vmem:[%s320_s1 + $0x60] ss:$8 sps:$4 sm:$0xff]   ;;  %v218_v5 = vld [vmem:[%s320_s1 + $0x54] ss:$8 sps:$4 sm:$0xff]   ;;  %v220_v6 = vld [vmem:[%s320_s1 + $0x50] ss:$8 sps:$4 sm:$0xff]  }
   0x3   :  { %127 = vmatpush1.bf16.msra.mxu0 %v214_v2  ;;  %v221_v7 = vld [vmem:[%s320_s1 + $0x44] ss:$8 sps:$4 sm:$0xff]   ;;  %v223_v8 = vld [vmem:[%s320_s1 + $0x40] ss:$8 sps:$4 sm:$0xff]   ;;  %v224_v9 = vld [vmem:[%s320_s1 + $0x34] ss:$8 sps:$4 sm:$0xff]  }
   0x4   :  { %128 = vmatprep.subr.bf16.mxu0 %v215_v3  ;;  %v226_v10 = vld [vmem:[%s320_s1 + $0x30] ss:$8 sps:$4 sm:$0xff]   ;;  %v227_v11 = vld [vmem:[%s320_s1 + $0x24] ss:$8 sps:$4 sm:$0xff]   ;;  %v229_v12 = vld [vmem:[%s320_s1 + $0x20] ss:$8 sps:$4 sm:$0xff]  }
   0x5   :  { %v230_v13 = vld [vmem:[%s320_s1 + $0x14] ss:$8 sps:$4 sm:$0xff]   ;;  %v232_v14 = vld [vmem:[%s320_s1 + $0x10] ss:$8 sps:$4 sm:$0xff]   ;;  %v233_v15 = vld [vmem:[%s320_s1 + $0x4] ss:$8 sps:$4 sm:$0xff]  }
   0x6   :  { %v235_v16 = vld [vmem:[%s320_s1] ss:$8 sps:$4 sm:$0xff]   ;;  %v37_v21 = vshrl.u32 %v36_v20, 7 }
   0x7   :  { %129 = vmatpush1.bf16.msra.mxu0 %v217_v4  ;;  %v15_v17 = vld [vmem:[%s321_s0] sm:$0xff]  ;;  %v16_v18 = vld [vmem:[%s321_s0 + $0x8] sm:$0xff] }
   0x8   :  { %130 = vmatprep.subr.bf16.mxu0 %v218_v5  ;;  %v17_v19 = vpack.c.bf16 %v16_v18, %v15_v17  ;;  %v38_v22 = vsub.s32 0, %v37_v21  ;;  %v34_v23 = vld [vmem:[%s322_s2] sm:$0x3]  ;;  %v42_v24 = vsub.s32 1, %v37_v21 }
   0xa   :  { %v39_v25 = vrot.slane %v34_v23, %v38_v22  ;;  %v43_v26 = vrot.slane %v34_v23, %v42_v24 }
   0xb   :  { %131 = vmatpush1.bf16.msra.mxu0 %v220_v6 }
   0xc   :  { %132 = vmatprep.subr.bf16.mxu0 %v221_v7 }
   0xf   :  { %133 = vmatpush1.bf16.msra.mxu0 %v223_v8 }
  0x10   :  { %134 = vmatprep.subr.bf16.mxu0 %v224_v9 }
  0x13   :  { %135 = vmatpush1.bf16.msra.mxu0 %v226_v10 }
  0x14   :  { %136 = vmatprep.subr.bf16.mxu0 %v227_v11 }
  0x17   :  { %137 = vmatpush1.bf16.msra.mxu0 %v229_v12 }
  0x18   :  { %138 = vmatprep.subr.bf16.mxu0 %v230_v13 }
  0x1b   :  { %139 = vmatpush1.bf16.msra.mxu0 %v232_v14 }
  0x1c   :  { %140 = vmatprep.subr.bf16.mxu0 %v233_v15 }
  0x1f   :  { %141 = vmatpush1.bf16.msra.mxu0 %v235_v16 }
  0x22   :  { %159 = vmatmul.mubr.bf16.vlgmr.msra.gmra.mxu0 %v17_v19 }
  0xe2   :  { %v160_v27 = vpop.f32.mrf.mxu0 }
  0xe3   :  { %v161_v28 = vadd.f32 %v160_v27, %v39_v25 }
  0xe4   :  { %v162_v29 = vpop.f32.mrf.mxu0 }
  0xe5   :  { %v163_v30 = vadd.f32 %v162_v29, %v43_v26  ;;  %v169_v32 = vmax.f32 %v161_v28, 0.0 }
  0xe6   :  { %v164_v31 = vpop.f32.mrf.mxu0 }
  0xe7   :  { %v170_v33 = vmax.f32 %v163_v30, 0.0  ;;  %v165_v34 = vadd.f32 %v164_v31, %v39_v25 }
  0xe8   :  { %v166_v35 = vpop.f32.mrf.mxu0 }
  0xe9   :  { %v209_v36 = vpack.c.bf16 %v170_v33, %v169_v32  ;;  %v167_v37 = vadd.f32 %v166_v35, %v43_v26  ;;  %v171_v38 = vmax.f32 %v165_v34, 0.0 }
  0xeb   :  { %185 = vst [vmem:[%s323_s3] sm:$0xff] %v209_v36  ;;  %v172_v39 = vmax.f32 %v167_v37, 0.0 }
  0xed   :  { %v210_v40 = vpack.c.bf16 %v172_v39, %v171_v38 }
  0xef   :  { %186 = vst [vmem:[%s323_s3 + $0x8] sm:$0xff] %v210_v40 }

</bundles_post_ra>
